<compile_context>
chip_gen: v7x
topology: tpu7x:2x2x1
jax: 0.10.0
libtpu: 0.0.40
codegen_flags: <defaults>
</compile_context>

<pallas_src>
import functools

import jax
import jax.numpy as jnp
from jax.experimental import pallas as pl
from jax.experimental.pallas import tpu as pltpu

LANE = 128     # TPU lane width
SUBLANE = 8    # TPU sublane width


def _round_up(x, m):
    return ((x + m - 1) // m) * m


def _cdiv(a, b):
    return -(-a // b)


def _emnist_kernel(z_ref, w1_ref, w2_ref, w3_ref, c_ref, out_ref, *, precision):
    """One batch tile of the 4-layer MLP energy network.

    z_ref   : (TILE_B, NZ_PAD)  latent tile (batch-padded only)
    w1_ref  : (NZ_PAD, P)       zero-padded (in, out) weight (VMEM-resident)
    w2/w3   : (P, P)            zero-padded (in, out) weights (VMEM-resident)
    c_ref   : (8, P)            packed constants:
                                  row 0..2 = b1, b2, b3 (zero-padded)
                                  row 3    = w4 row (zero-padded)
                                  row 4[0] = log_partition
    out_ref : (TILE_B, LANE)    energy broadcast across 128 lanes (lane-dense
                                unmasked store; wrapper keeps column 0)
    """

    def leaky(v):
        # LeakyReLU(0.2): single mul + max on the VPU.
        return jnp.maximum(v, 0.2 * v)

    # Layer 1: Linear(nz, ndf) + LeakyReLU(0.2)
    h = jnp.dot(z_ref[...], w1_ref[...],
                preferred_element_type=jnp.float32, precision=precision)
    h = leaky(h + c_ref[0:1, :])
    # Layer 2: Linear(ndf, ndf) + LeakyReLU(0.2)
    h = jnp.dot(h, w2_ref[...],
                preferred_element_type=jnp.float32, precision=precision)
    h = leaky(h + c_ref[1:2, :])
    # Layer 3: Linear(ndf, ndf) + LeakyReLU(0.2)
    h = jnp.dot(h, w3_ref[...],
                preferred_element_type=jnp.float32, precision=precision)
    h = leaky(h + c_ref[2:3, :])
    # Layer 4: Linear(ndf, 1, bias=False) -> VPU multiply + lane reduction
    # (an N=1 MXU matmul would use one column of the array and still pay full
    #  push/drain latency).
    e = jnp.sum(h * c_ref[3:4, :], axis=-1, keepdims=True)          # (TILE_B, 1)
    # + log_partition; broadcast across lanes so the store is unmasked.
    out_ref[...] = jnp.broadcast_to(e + c_ref[4:5, 0:1], out_ref.shape)


def prepare_params(params):
    """One-time (outside the hot path) packing of PyTorch-layout params into
    lane-dense, pre-transposed, zero-padded kernel operands."""
    ndf, nz = params["w1"].shape                 # PyTorch Linear weight: (out, in)
    P = _round_up(max(ndf, 1), LANE)             # hidden width padded to lanes
    nz_pad = _round_up(max(nz, 1), SUBLANE)      # latent width padded to sublanes only

    def pad_w(w_out_in, rows, fan_in, fan_out):
        wt = jnp.asarray(w_out_in, jnp.float32).T        # (in, out)
        return jnp.zeros((rows, P), jnp.float32).at[:fan_in, :fan_out].set(wt)

    w1 = pad_w(params["w1"], nz_pad, nz, ndf)
    w2 = pad_w(params["w2"], P, ndf, ndf)
    w3 = pad_w(params["w3"], P, ndf, ndf)

    consts = jnp.zeros((8, P), jnp.float32)
    consts = consts.at[0, :ndf].set(jnp.asarray(params["b1"], jnp.float32))
    consts = consts.at[1, :ndf].set(jnp.asarray(params["b2"], jnp.float32))
    consts = consts.at[2, :ndf].set(jnp.asarray(params["b3"], jnp.float32))
    consts = consts.at[3, :ndf].set(jnp.asarray(params["w4"], jnp.float32).reshape(-1))
    consts = consts.at[4, 0].set(jnp.asarray(params["log_partition"], jnp.float32))
    return {"w1": w1, "w2": w2, "w3": w3, "consts": consts,
            "nz": nz, "ndf": ndf, "P": P, "nz_pad": nz_pad}


def _default_min_grid_steps():
    """v7x has 2 TensorCores per chip: keep >= 2 grid steps so the 'parallel'
    batch axis can shard across both. v5e/v6e have 1 TC, 1 step is fine."""
    try:
        kind = jax.devices()[0].device_kind.lower()
    except Exception:
        return 1
    return 2 if "v7" in kind else 1


def _choose_batch_tiling(B, max_tile_b, min_grid_steps):
    b8 = _round_up(max(B, 1), SUBLANE)
    n_tiles = _cdiv(b8, max_tile_b)
    # v7x: force >= 2 grid steps (only when there is enough work to split).
    if min_grid_steps > 1 and b8 >= SUBLANE * min_grid_steps:
        n_tiles = max(n_tiles, min_grid_steps)
    # Balance the tile size so an awkward B doesn't pad ~2x (e.g. B=300 ->
    # tile 304 in one step rather than 2 x 256 = 512 rows).
    tile_b = _round_up(_cdiv(B, n_tiles), SUBLANE)
    return tile_b, n_tiles * tile_b, n_tiles


def e_mnist_forward(z, prep, *, max_tile_b=1024, min_grid_steps=None,
                    precision=jax.lax.Precision.HIGHEST):
    """Pallas forward pass of E_MNIST.

    z: (B, nz, 1, 1) or (B, nz); returns (B, 1) float32.
    """
    P, nz, nz_pad = prep["P"], prep["nz"], prep["nz_pad"]
    B = z.shape[0]
    # Equivalent to z.squeeze() for (B, nz, 1, 1) but safe for nz == 1.
    z2d = z.reshape(B, -1).astype(jnp.float32)

    if min_grid_steps is None:
        min_grid_steps = _default_min_grid_steps()
    tile_b, B_pad, n_tiles = _choose_batch_tiling(B, max_tile_b, min_grid_steps)

    # Pad only the batch axis (plus nz -> next sublane multiple); the latent
    # feature axis is NOT padded to 128 lanes, so no mostly-zero (B, 128)
    # array is materialized and DMA'd every call.
    z_pad = jnp.pad(z2d, ((0, B_pad - B), (0, nz_pad - nz)))

    # VMEM budget: resident weights + double-buffered z/out tiles + headroom.
    # TODO(synk): for P >= 1024, stream K-panels of w2/w3 over an extra
    # "arbitrary" grid axis (and/or single-buffer the resident weight specs)
    # instead of keeping all three (P, P) weights VMEM-resident.
    weight_bytes = (nz_pad * P + 2 * P * P + 8 * P) * 4
    io_bytes = (tile_b * nz_pad + tile_b * LANE) * 4
    vmem_limit = int(min(max(2 * (weight_bytes + io_bytes) + (4 << 20), 16 << 20),
                         100 << 20))

    kernel = functools.partial(_emnist_kernel, precision=precision)

    out = pl.pallas_call(
        kernel,
        # Lane-dense output: energy broadcast across 128 lanes per row; the
        # wrapper slices column 0. (Unmasked full-width stores + contiguous
        # DMA instead of masked 1-lane stores.)
        out_shape=jax.ShapeDtypeStruct((B_pad, LANE), jnp.float32),
        grid=(n_tiles,),
        in_specs=[
            pl.BlockSpec((tile_b, nz_pad), lambda i: (i, 0)),   # z: pipelined
            pl.BlockSpec((nz_pad, P), lambda i: (0, 0)),        # w1: resident
            pl.BlockSpec((P, P), lambda i: (0, 0)),             # w2: resident
            pl.BlockSpec((P, P), lambda i: (0, 0)),             # w3: resident
            pl.BlockSpec((8, P), lambda i: (0, 0)),             # packed consts
        ],
        out_specs=pl.BlockSpec((tile_b, LANE), lambda i: (i, 0)),
        compiler_params=pltpu.CompilerParams(
            dimension_semantics=("parallel",),
            vmem_limit_bytes=vmem_limit),
    )(z_pad, prep["w1"], prep["w2"], prep["w3"], prep["consts"])
    return out[:B, :1]


def init_params(key, nz, ndf):
    """Deterministic synthetic parameter init (PyTorch Linear shapes)."""
    ks = jax.random.split(key, 8)

    def lin(kw, kb, fan_in, fan_out, bias=True):
        bound = 1.0 / jnp.sqrt(fan_in)
        w = jax.random.uniform(kw, (fan_out, fan_in), jnp.float32, -bound, bound)
        b = (jax.random.uniform(kb, (fan_out,), jnp.float32, -bound, bound)
             if bias else None)
        return w, b

    w1, b1 = lin(ks[0], ks[1], nz, ndf)
    w2, b2 = lin(ks[2], ks[3], ndf, ndf)
    w3, b3 = lin(ks[4], ks[5], ndf, ndf)
    w4, _ = lin(ks[6], ks[7], ndf, 1, bias=False)
    return {
        "w1": w1, "b1": b1,
        "w2": w2, "b2": b2,
        "w3": w3, "b3": b3,
        "w4": w4,
        "log_partition": jnp.array(0.0, jnp.float32),
    }


def _reference_forward(z, params):
    """Pure-JAX reference mirroring the PyTorch semantics (f32 exact)."""
    hi = jax.lax.Precision.HIGHEST
    B = z.shape[0]
    x = z.reshape(B, -1).astype(jnp.float32)

    def leaky(v):
        return jnp.where(v > 0, v, 0.2 * v)

    h = leaky(jnp.dot(x, params["w1"].T, precision=hi) + params["b1"])
    h = leaky(jnp.dot(h, params["w2"].T, precision=hi) + params["b2"])
    h = leaky(jnp.dot(h, params["w3"].T, precision=hi) + params["b3"])
    e = jnp.dot(h, params["w4"].T, precision=hi)
    return e + params["log_partition"]


if __name__ == "__main__":
    key = jax.random.PRNGKey(0)
    k_param, k_z, k_z2 = jax.random.split(key, 3)

    B, NZ, NDF = 2, 16, 32
    params = init_params(k_param, NZ, NDF)
    prep = prepare_params(params)          # one-time packing/padding

    # Latent z as produced by a typical generator pipeline: (B, nz, 1, 1)
    z = jax.random.normal(k_z, (B, NZ, 1, 1), jnp.float32)
    out = jax.block_until_ready(e_mnist_forward(z, prep))
    ref = _reference_forward(z, params)
    assert out.shape == (B, 1)
    assert jnp.allclose(out, ref, atol=1e-5, rtol=1e-5)

    # Second run with an awkward batch + tiny tile cap to exercise the
    # multi-step grid pipeline and the balanced tail-tile padding.
    B2 = 13
    z2 = jax.random.normal(k_z2, (B2, NZ, 1, 1), jnp.float32)
    out2 = jax.block_until_ready(
        e_mnist_forward(z2, prep, max_tile_b=8, min_grid_steps=2))
    ref2 = _reference_forward(z2, params)
    assert out2.shape == (B2, 1)
    assert jnp.allclose(out2, ref2, atol=1e-5, rtol=1e-5)

    print("KERNEL_OK")
</pallas_src>

<mosaic_0001>
module attributes {stable_mosaic.version = 11 : i64} {
  func.func @_emnist_kernel(%arg0: i32, %arg1: memref<8x16xf32, #tpu.memory_space<vmem>>, %arg2: memref<16x128xf32, #tpu.memory_space<vmem>>, %arg3: memref<128x128xf32, #tpu.memory_space<vmem>>, %arg4: memref<128x128xf32, #tpu.memory_space<vmem>>, %arg5: memref<8x128xf32, #tpu.memory_space<vmem>>, %arg6: memref<8x128xf32, #tpu.memory_space<vmem>>) attributes {dimension_semantics = [#tpu.dimension_semantics<parallel>], iteration_bounds = array<i64: 1>, scalar_prefetch = 0 : i64, scratch_operands = 0 : i64, tpu.core_type = #tpu.core_type<tc>, window_params = [{transform_indices = @transform_0, window_bounds = array<i64: 8, 16>}, {pipeline_mode = #tpu.pipeline_mode<synchronous>, transform_indices = @transform_1, window_bounds = array<i64: 16, 128>}, {pipeline_mode = #tpu.pipeline_mode<synchronous>, transform_indices = @transform_2, window_bounds = array<i64: 128, 128>}, {pipeline_mode = #tpu.pipeline_mode<synchronous>, transform_indices = @transform_3, window_bounds = array<i64: 128, 128>}, {pipeline_mode = #tpu.pipeline_mode<synchronous>, transform_indices = @transform_4, window_bounds = array<i64: 8, 128>}, {transform_indices = @transform_5, window_bounds = array<i64: 8, 128>}]} {
    %c0 = arith.constant 0 : index
    %c0_0 = arith.constant 0 : index
    %0 = vector.load %arg1[%c0, %c0_0] : memref<8x16xf32, #tpu.memory_space<vmem>>, vector<8x16xf32>
    %c0_1 = arith.constant 0 : index
    %c0_2 = arith.constant 0 : index
    %1 = vector.load %arg2[%c0_1, %c0_2] : memref<16x128xf32, #tpu.memory_space<vmem>>, vector<16x128xf32>
    %cst = arith.constant dense<0.000000e+00> : vector<8x128xf32>
    %2 = tpu.matmul %0, %1, %cst {dimension_numbers = #tpu.dot_dimension_numbers<[1], [0], [0], [1], [0, 0, 1, 1], [], []>, precision = #tpu.contract_precision<fp32>} : vector<8x16xf32>, vector<16x128xf32>, vector<8x128xf32> -> vector<8x128xf32>
    %c0_3 = arith.constant 0 : index
    %c0_4 = arith.constant 0 : index
    %3 = vector.load %arg5[%c0_3, %c0_4] : memref<8x128xf32, #tpu.memory_space<vmem>>, vector<1x128xf32>
    %4 = vector.broadcast %3 : vector<1x128xf32> to vector<8x128xf32>
    %5 = arith.addf %2, %4 : vector<8x128xf32>
    %cst_5 = arith.constant 2.000000e-01 : f32
    %6 = vector.broadcast %cst_5 : f32 to vector<8x128xf32>
    %7 = arith.mulf %6, %5 : vector<8x128xf32>
    %8 = arith.maximumf %5, %7 : vector<8x128xf32>
    %c0_6 = arith.constant 0 : index
    %c0_7 = arith.constant 0 : index
    %9 = vector.load %arg3[%c0_6, %c0_7] : memref<128x128xf32, #tpu.memory_space<vmem>>, vector<128x128xf32>
    %cst_8 = arith.constant dense<0.000000e+00> : vector<8x128xf32>
    %10 = tpu.matmul %8, %9, %cst_8 {dimension_numbers = #tpu.dot_dimension_numbers<[1], [0], [0], [1], [0, 0, 1, 1], [], []>, precision = #tpu.contract_precision<fp32>} : vector<8x128xf32>, vector<128x128xf32>, vector<8x128xf32> -> vector<8x128xf32>
    %c1 = arith.constant 1 : index
    %c0_9 = arith.constant 0 : index
    %11 = vector.load %arg5[%c1, %c0_9] : memref<8x128xf32, #tpu.memory_space<vmem>>, vector<1x128xf32>
    %12 = vector.broadcast %11 : vector<1x128xf32> to vector<8x128xf32>
    %13 = arith.addf %10, %12 : vector<8x128xf32>
    %cst_10 = arith.constant 2.000000e-01 : f32
    %14 = vector.broadcast %cst_10 : f32 to vector<8x128xf32>
    %15 = arith.mulf %14, %13 : vector<8x128xf32>
    %16 = arith.maximumf %13, %15 : vector<8x128xf32>
    %c0_11 = arith.constant 0 : index
    %c0_12 = arith.constant 0 : index
    %17 = vector.load %arg4[%c0_11, %c0_12] : memref<128x128xf32, #tpu.memory_space<vmem>>, vector<128x128xf32>
    %cst_13 = arith.constant dense<0.000000e+00> : vector<8x128xf32>
    %18 = tpu.matmul %16, %17, %cst_13 {dimension_numbers = #tpu.dot_dimension_numbers<[1], [0], [0], [1], [0, 0, 1, 1], [], []>, precision = #tpu.contract_precision<fp32>} : vector<8x128xf32>, vector<128x128xf32>, vector<8x128xf32> -> vector<8x128xf32>
    %c2 = arith.constant 2 : index
    %c0_14 = arith.constant 0 : index
    %19 = vector.load %arg5[%c2, %c0_14] : memref<8x128xf32, #tpu.memory_space<vmem>>, vector<1x128xf32>
    %20 = vector.broadcast %19 : vector<1x128xf32> to vector<8x128xf32>
    %21 = arith.addf %18, %20 : vector<8x128xf32>
    %cst_15 = arith.constant 2.000000e-01 : f32
    %22 = vector.broadcast %cst_15 : f32 to vector<8x128xf32>
    %23 = arith.mulf %22, %21 : vector<8x128xf32>
    %24 = arith.maximumf %21, %23 : vector<8x128xf32>
    %c3 = arith.constant 3 : index
    %c0_16 = arith.constant 0 : index
    %25 = vector.load %arg5[%c3, %c0_16] : memref<8x128xf32, #tpu.memory_space<vmem>>, vector<1x128xf32>
    %26 = vector.broadcast %25 : vector<1x128xf32> to vector<8x128xf32>
    %27 = arith.mulf %24, %26 : vector<8x128xf32>
    %cst_17 = arith.constant dense<0.000000e+00> : vector<8xf32>
    %28 = vector.multi_reduction <add>, %27, %cst_17 [1] : vector<8x128xf32> to vector<8xf32>
    %29 = vector.shape_cast %28 : vector<8xf32> to vector<8x1xf32>
    %c4 = arith.constant 4 : index
    %c0_18 = arith.constant 0 : index
    %30 = vector.load %arg5[%c4, %c0_18] : memref<8x128xf32, #tpu.memory_space<vmem>>, vector<1x1xf32>
    %31 = vector.broadcast %30 : vector<1x1xf32> to vector<8x1xf32>
    %32 = arith.addf %29, %31 : vector<8x1xf32>
    %33 = vector.shape_cast %32 : vector<8x1xf32> to vector<8x1xf32>
    %34 = vector.broadcast %33 : vector<8x1xf32> to vector<8x128xf32>
    %c0_19 = arith.constant 0 : index
    %c0_20 = arith.constant 0 : index
    %35 = vector.load %arg6[%c0_19, %c0_20] : memref<8x128xf32, #tpu.memory_space<vmem>>, vector<8x128xf32>
    tpu.vector_store %arg6[%c0_19, %c0_20], %34 {strides = array<i32>} : memref<8x128xf32, #tpu.memory_space<vmem>>, vector<8x128xf32>,
    return
  }
  func.func @transform_0(%arg0: i32) -> (i32, i32) {
    %c0_i32 = arith.constant 0 : i32
    %c0_i32_0 = arith.constant 0 : i32
    return %arg0, %c0_i32 : i32, i32
  }
  func.func @transform_1(%arg0: i32) -> (i32, i32) {
    %c0_i32 = arith.constant 0 : i32
    %c0_i32_0 = arith.constant 0 : i32
    %c0_i32_1 = arith.constant 0 : i32
    return %c0_i32, %c0_i32_0 : i32, i32
  }
  func.func @transform_2(%arg0: i32) -> (i32, i32) {
    %c0_i32 = arith.constant 0 : i32
    %c0_i32_0 = arith.constant 0 : i32
    %c0_i32_1 = arith.constant 0 : i32
    return %c0_i32, %c0_i32_0 : i32, i32
  }
  func.func @transform_3(%arg0: i32) -> (i32, i32) {
    %c0_i32 = arith.constant 0 : i32
    %c0_i32_0 = arith.constant 0 : i32
    %c0_i32_1 = arith.constant 0 : i32
    return %c0_i32, %c0_i32_0 : i32, i32
  }
  func.func @transform_4(%arg0: i32) -> (i32, i32) {
    %c0_i32 = arith.constant 0 : i32
    %c0_i32_0 = arith.constant 0 : i32
    %c0_i32_1 = arith.constant 0 : i32
    return %c0_i32, %c0_i32_0 : i32, i32
  }
  func.func @transform_5(%arg0: i32) -> (i32, i32) {
    %c0_i32 = arith.constant 0 : i32
    %c0_i32_0 = arith.constant 0 : i32
    return %arg0, %c0_i32 : i32, i32
  }
}

</mosaic_0001>

<bundles_post_ra>
// kernel: tpu_custom_call.1
= control target key start
LH: loop header
LB: loop body
LE: loop exit
PB: predicated region body
PF: predicated region fallthrough
CT: control target
= control target key end

     0   :  { %10 = vsyncpa [#allocation3], 0  ;;  %s3754_s0 = inlined_call_operand.hbm [shape: f32[8,16], index: 0, kind: input, shape index: {}]   ;;  %s3755_s1 = inlined_call_operand.hbm [shape: f32[16,128], index: 1, kind: input, shape index: {}]   ;;  %s3756_s2 = inlined_call_operand.hbm [shape: f32[128,128], index: 2, kind: input, shape index: {}]   ;;  %s3757_s3 = inlined_call_operand.hbm [shape: f32[128,128], index: 3, kind: input, shape index: {}]   ;;  %s3758_s4 = inlined_call_operand.vmem [shape: f32[8,128], index: 4, kind: input, shape index: {}]   ;;  %s3759_s5 = inlined_call_operand.hbm [shape: f32[8,128], index: 5, kind: output, shape index: {}]  }
   0x1   :  { %11 = vsyncpa [#allocation6], 0 }
   0x2   :  { %12 = vsyncpa [#allocation9], 0 }
   0x3   :  { %13 = vsyncpa [#allocation4], 0  ;;  %s3069_s18 = smov [#allocation5]   ;;  %s2951_s22 = scalar_lea.hbm %s3755_s1, 256 }
   0x4   :  { %s29_s19 = sshll.u32 %s3069_s18, 4  ;;  %p2952_p0 = scmp.ne.s32.totalorder %s3755_s1, %s2951_s22  ;;  %s30_s19 = int_to_ptr.vmem [resolvable:$true] %s29_s19 }
   0x5   :  { %p2955_p1 = scmp.lt.u32.totalorder %s2951_s22, %s3755_s1 }
   0x7   :  { %p2957_p2 = pnand %p2955_p1, %p2952_p0 }
   0x9   :  { %2960 = shalt.err (!%p2957_p2)
}
   0xa   :  { %s2961_s27 = scalar_lea.vmem %s30_s19, 256  ;;  %p2966_p4 = scmp.lt.s32.totalorder %s30_s19, %s30_s19 }
   0xb   :  { %p2962_p3 = scmp.ne.s32.totalorder %s30_s19, %s2961_s27  ;;  %p2967_p5 = scmp.lt.s32.totalorder %s2961_s27, %s2961_s27 }
   0xd   :  { %p2968_p6 = por %p2967_p5, %p2966_p4 }
   0xf   :  { %p2969_p7 = pnand %p2968_p6, %p2962_p3 }
  0x11   :  { %2972 = shalt.err (!%p2969_p7)
}
  0x12   :  { %s3070_s28 = smov 128   ;;  %s3071_s29 = smov 8  }
  0x13   :  { %35 = dma.hbm_to_vmem [thread:$0]  %s3755_s1, 256, %s30_s19, [#allocation6], %s3070_s28, %s3070_s28, %s3071_s29  }
  0x14   :  { %s3072_s7 = smov [#allocation2]   ;;  %s3073_s9 = smov [#allocation7]  }
  0x15   :  { %s20_s8 = sshll.u32 %s3072_s7, 4  ;;  %s41_s10 = sshll.u32 %s3073_s9, 4  ;;  %s21_s8 = int_to_ptr.vmem [resolvable:$true] %s20_s8  ;;  %s42_s10 = int_to_ptr.vmem [resolvable:$true] %s41_s10 }
  0x16   :  { %s2973_s13 = scalar_lea.hbm %s3754_s0, 128 }
  0x17   :  { %p2974_p8 = scmp.ne.s32.totalorder %s3754_s0, %s2973_s13  ;;  %p2977_p9 = scmp.lt.u32.totalorder %s2973_s13, %s3754_s0 }
  0x19   :  { %p2979_p10 = pnand %p2977_p9, %p2974_p8 }
  0x1b   :  { %2982 = shalt.err (!%p2979_p10)
}
  0x1c   :  { %s2983_s1 = scalar_lea.vmem %s21_s8, 128  ;;  %p2988_p12 = scmp.lt.s32.totalorder %s21_s8, %s21_s8 }
  0x1d   :  { %p2984_p11 = scmp.ne.s32.totalorder %s21_s8, %s2983_s1  ;;  %p2989_p13 = scmp.lt.s32.totalorder %s2983_s1, %s2983_s1 }
  0x1f   :  { %p2990_p0 = por %p2989_p13, %p2988_p12 }
  0x21   :  { %p2991_p1 = pnand %p2990_p0, %p2984_p11 }
  0x23   :  { %2994 = shalt.err (!%p2991_p1)
}
  0x24   :  { %23 = dma.hbm_to_vmem [thread:$0]  %s3754_s0, 128, %s21_s8, [#allocation3]  }
  0x25   :  { %s2995_s22 = scalar_lea.hbm %s3756_s2, 2048 }
  0x26   :  { %p2996_p2 = scmp.ne.s32.totalorder %s3756_s2, %s2995_s22  ;;  %p2999_p3 = scmp.lt.u32.totalorder %s2995_s22, %s3756_s2 }
  0x28   :  { %p3001_p4 = pnand %p2999_p3, %p2996_p2 }
  0x2a   :  { %3004 = shalt.err (!%p3001_p4)
}
  0x2b   :  { %s3005_s27 = scalar_lea.vmem %s42_s10, 2048  ;;  %p3010_p6 = scmp.lt.s32.totalorder %s42_s10, %s42_s10 }
  0x2c   :  { %p3006_p5 = scmp.ne.s32.totalorder %s42_s10, %s3005_s27  ;;  %p3011_p7 = scmp.lt.s32.totalorder %s3005_s27, %s3005_s27 }
  0x2e   :  { %p3012_p8 = por %p3011_p7, %p3010_p6 }
  0x30   :  { %p3013_p9 = pnand %p3012_p8, %p3006_p5 }
  0x32   :  { %3016 = shalt.err (!%p3013_p9)
}
  0x33   :  { %47 = dma.hbm_to_vmem [thread:$0]  %s3756_s2, 2048, %s42_s10, [#allocation6], %s3070_s28, %s3070_s28, %s3071_s29  }
  0x34   :  { %s3074_s6 = smov [#allocation8]   ;;  %s3017_s11 = scalar_lea.hbm %s3757_s3, 2048 }
  0x35   :  { %s53_s7 = sshll.u32 %s3074_s6, 4  ;;  %p3018_p10 = scmp.ne.s32.totalorder %s3757_s3, %s3017_s11  ;;  %s54_s7 = int_to_ptr.vmem [resolvable:$true] %s53_s7 }
  0x36   :  { %p3021_p11 = scmp.lt.u32.totalorder %s3017_s11, %s3757_s3 }
  0x38   :  { %p3023_p12 = pnand %p3021_p11, %p3018_p10 }
  0x3a   :  { %3026 = shalt.err (!%p3023_p12)
}
  0x3b   :  { %s3027_s16 = scalar_lea.vmem %s54_s7, 2048  ;;  %p3032_p0 = scmp.lt.s32.totalorder %s54_s7, %s54_s7 }
  0x3c   :  { %p3028_p13 = scmp.ne.s32.totalorder %s54_s7, %s3027_s16  ;;  %p3033_p1 = scmp.lt.s32.totalorder %s3027_s16, %s3027_s16 }
  0x3e   :  { %p3034_p2 = por %p3033_p1, %p3032_p0 }
  0x40   :  { %p3035_p3 = pnand %p3034_p2, %p3028_p13 }
  0x42   :  { %3038 = shalt.err (!%p3035_p3)
}
  0x43   :  { %59 = dma.hbm_to_vmem [thread:$0]  %s3757_s3, 2048, %s54_s7, [#allocation9], %s3070_s28, %s3070_s28, %s3071_s29  }
  0x44   :  { %3061 = dma.done.wait [#allocation3], 128  }
  0x45   :  { %3062 = vsyncadd [#allocation3], 4294967168 }
  0x46   :  { %3063 = dma.done.wait [#allocation6], 2304  }
  0x47   :  { %3064 = vsyncadd [#allocation6], 4294964992 }
  0x48   :  { %3065 = dma.done.wait [#allocation9], 2048  }
  0x49   :  { %3066 = vsyncadd [#allocation9], 4294965248  ;;  %v3075_v0 = vmov 0.0|0.0   ;;  %vm3076_vm0 = vmmov 0   ;;  %v3077_v1 = vmov 0.0   ;;  %vm82_vm1 = vcmask 130048  }
  0x4a   :  { %2610 = vmatprep.subr.bf16.mxu0 %v3075_v0  ;;  %2164 = vmatprep.mubr.msk.f32.mxu0 %vm3076_vm0, %v3077_v1  ;;  %v75_v2 = vld [vmem:[#allocation5] sm:$0xff]  ;;  %v76_v3 = vld [vmem:[#allocation5 + $0x8] sm:$0xff]  ;;  %v74_v4 = vld [vmem:[#allocation2] sm:$0xff]  ;;  %s3079_s23 = smov [#allocation10]  }
  0x4b   :  { %2601 = vmatprep.subr.bf16.mxu1 %v3075_v0  ;;  %2143 = vmatprep.mubr.msk.f32.mxu1 %vm3076_vm0, %v3077_v1  ;;  %v87_v5 = vand.u32 4294901760, %v75_v2  ;;  %v90_v6 = vand.u32 4294901760, %v76_v3  ;;  %v84_v7 = vsel %vm82_vm1, %v74_v4, 0  ;;  %v547_v8 = vld [vmem:[#allocation7] sm:$0xff]  ;;  %v548_v9 = vld [vmem:[#allocation7 + $0x8] sm:$0xff]  ;;  %v549_v10 = vld [vmem:[#allocation7 + $0x10] sm:$0xff] }
  0x4c   :  { %v153_v11 = vand.u32 4294901760, %v84_v7  ;;  %v569_v12 = vand.u32 4294901760, %v547_v8  ;;  %v572_v13 = vand.u32 4294901760, %v548_v9  ;;  %v550_v14 = vld [vmem:[#allocation7 + $0x18] sm:$0xff]  ;;  %v575_v18 = vand.u32 4294901760, %v549_v10  ;;  %v551_v19 = vld [vmem:[#allocation7 + $0x20] sm:$0xff] }
  0x4d   :  { %v2602_v15 = vpack.c.bf16 %v90_v6, %v87_v5  ;;  %v165_v16 = vsub.f32 %v75_v2, %v87_v5  ;;  %v172_v17 = vsub.f32 %v76_v3, %v90_v6  ;;  %v578_v23 = vand.u32 4294901760, %v550_v14  ;;  %v552_v24 = vld [vmem:[#allocation7 + $0x28] sm:$0xff]  ;;  %v553_v46 = vld [vmem:[#allocation7 + $0x30] sm:$0xff]  ;;  %v554_v47 = vld [vmem:[#allocation7 + $0x38] sm:$0xff]  ;;  %s1901_s24 = sshll.u32 %s3079_s23, 4  ;;  %s1902_s24 = int_to_ptr.vmem [resolvable:$true] %s1901_s24 }
  0x4e   :  { %v154_v20 = vsub.f32 %v84_v7, %v153_v11  ;;  %v3173_v21 = vsub.f32 %v547_v8, %v569_v12  ;;  %v3175_v22 = vsub.f32 %v548_v9, %v572_v13  ;;  %v3179_v28 = vsub.f32 %v549_v10, %v575_v18  ;;  %v555_v53 = vld [vmem:[#allocation7 + $0x40] sm:$0xff]  ;;  %v556_v54 = vld [vmem:[#allocation7 + $0x48] sm:$0xff]  ;;  %v557_v58 = vld [vmem:[#allocation7 + $0x50] sm:$0xff]  ;;  %s3039_s25 = scalar_lea.vmem %s1902_s24, 128  ;;  %p3044_p5 = scmp.lt.s32.totalorder %s1902_s24, %s1902_s24 }
  0x4f   :  { %2612 = vmatpush3.bf16.msra.mxu0 %v2602_v15  ;;  %2603 = vmatpush3.bf16.msra.mxu1 %v2602_v15  ;;  %v166_v25 = vand.u32 4294901760, %v165_v16  ;;  %v173_v26 = vand.u32 4294901760, %v172_v17  ;;  %v3181_v29 = vsub.f32 %v550_v14, %v578_v23  ;;  %v581_v30 = vand.u32 4294901760, %v551_v19  ;;  %v558_v59 = vld [vmem:[#allocation7 + $0x58] sm:$0xff]  ;;  %v559_v63 = vld [vmem:[#allocation7 + $0x60] sm:$0xff]  ;;  %v560_v2 = vld [vmem:[#allocation7 + $0x68] sm:$0xff]  ;;  %p3040_p4 = scmp.ne.s32.totalorder %s1902_s24, %s3039_s25  ;;  %p3045_p6 = scmp.lt.s32.totalorder %s3039_s25, %s3039_s25 }
  0x50   :  { %v155_v27 = vand.u32 4294901760, %v154_v20  ;;  %2604 = vmatprep.subr.bf16.mxu1 %v3075_v0  ;;  %2613 = vmatprep.subr.bf16.mxu0 %v3075_v0  ;;  %v584_v34 = vand.u32 4294901760, %v552_v24  ;;  %v2608_v42 = vpack.c.bf16 %v172_v17, %v165_v16  ;;  %v3199_v43 = vpack.c.bf16 %v572_v13, %v569_v12  ;;  %v561_v6 = vld [vmem:[#allocation7 + $0x70] sm:$0xff]  ;;  %v562_v7 = vld [vmem:[#allocation7 + $0x78] sm:$0xff] }
  0x51   :  { %v167_v31 = vsub.f32 %v165_v16, %v166_v25  ;;  %v174_v32 = vsub.f32 %v172_v17, %v173_v26  ;;  %v2614_v33 = vpack.c.bf16 %v173_v26, %v166_v25  ;;  %v3183_v36 = vsub.f32 %v551_v19, %v581_v30  ;;  %p3046_p7 = por %p3045_p6, %p3044_p5 }
  0x52   :  { %2165 = vmatmul.mubr.f32.vlgmr.msra.gmra.mrb[0].mxu0 %v155_v27  ;;  %v156_v35 = vsub.f32 %v154_v20, %v155_v27  ;;  %v3187_v39 = vsub.f32 %v552_v24, %v584_v34  ;;  %v3204_v44 = vpack.c.bf16 %v578_v23, %v575_v18  ;;  %v3210_v45 = vpack.c.bf16 %v584_v34, %v581_v30 }
  0x53   :  { %v168_v37 = vand.u32 4294901760, %v167_v31  ;;  %v175_v38 = vand.u32 4294901760, %v174_v32  ;;  %2615 = vmatpush3.bf16.msra.mxu0 %v2614_v33  ;;  %2171 = vmatprep.mubr.msk.f32.mxu0 %vm3076_vm0, %v3077_v1  ;;  %v587_v48 = vand.u32 4294901760, %v553_v46  ;;  %v590_v49 = vand.u32 4294901760, %v554_v47  ;;  %p3047_p8 = pnand %p3046_p7, %p3040_p4 }
  0x54   :  { %v157_v40 = vand.u32 4294901760, %v156_v35  ;;  %2616 = vmatprep.subr.bf16.mxu0 %v3075_v0  ;;  %v593_v55 = vand.u32 4294901760, %v555_v53  ;;  %v596_v56 = vand.u32 4294901760, %v556_v54  ;;  %v599_v60 = vand.u32 4294901760, %v557_v58 }
  0x55   :  { %v2605_v41 = vpack.c.bf16 %v175_v38, %v168_v37  ;;  %v3215_v50 = vpack.c.bf16 %v590_v49, %v587_v48  ;;  %v3217_v51 = vsub.f32 %v553_v46, %v587_v48  ;;  %v3219_v52 = vsub.f32 %v554_v47, %v590_v49 }
  0x56   :  { %2144 = vmatmul.mubr.f32.vlgmr.msra.gmra.mrb[0].mxu1 %v157_v40  ;;  %v3223_v57 = vpack.c.bf16 %v596_v56, %v593_v55  ;;  %v602_v61 = vand.u32 4294901760, %v558_v59  ;;  %v605_v3 = vand.u32 4294901760, %v559_v63  ;;  %v608_v4 = vand.u32 4294901760, %v560_v2 }
  0x57   :  { %2606 = vmatpush3.bf16.msra.mxu1 %v2605_v41  ;;  %2150 = vmatprep.mubr.msk.f32.mxu1 %vm3076_vm0, %v3077_v1  ;;  %v3233_v8 = vsub.f32 %v555_v53, %v593_v55  ;;  %v3235_v9 = vsub.f32 %v556_v54, %v596_v56  ;;  %v3237_v10 = vsub.f32 %v557_v58, %v599_v60  ;;  %v611_v14 = vand.u32 4294901760, %v561_v6 }
  0x58   :  { %2607 = vmatprep.subr.bf16.mxu1 %v3075_v0  ;;  %v3227_v62 = vpack.c.bf16 %v602_v61, %v599_v60  ;;  %v3231_v5 = vpack.c.bf16 %v608_v4, %v605_v3  ;;  %v3242_v12 = vsub.f32 %v559_v63, %v605_v3  ;;  %v3244_v13 = vsub.f32 %v560_v2, %v608_v4 }
  0x59   :  { %v662_v16 = vand.u32 4294901760, %v3173_v21  ;;  %v669_v17 = vand.u32 4294901760, %v3175_v22  ;;  %v3251_v19 = vsub.f32 %v561_v6, %v611_v14  ;;  %v676_v25 = vand.u32 4294901760, %v3179_v28 }
  0x5a   :  { %2172 = vmatmul.mubr.f32.vlgmr.msra.gmra.mrb[0].mxu0 %v153_v11  ;;  %v683_v26 = vand.u32 4294901760, %v3181_v29  ;;  %v690_v37 = vand.u32 4294901760, %v3183_v36  ;;  %v697_v38 = vand.u32 4294901760, %v3187_v39  ;;  %v3769_v48 = vand.u32 4294901760, %v3217_v51 }
  0x5b   :  { %2618 = vmatpush3.bf16.msra.mxu0 %v2602_v15  ;;  %2178 = vmatprep.mubr.msk.f32.mxu0 %vm3076_vm0, %v3077_v1  ;;  %v614_v15 = vand.u32 4294901760, %v562_v7  ;;  %v663_v23 = vsub.f32 %v3173_v21, %v662_v16  ;;  %v670_v24 = vsub.f32 %v3175_v22, %v669_v17  ;;  %v677_v31 = vsub.f32 %v3179_v28, %v676_v25 }
  0x5c   :  { %2763 = vmatprep.subr.bf16.mxu0 %v3075_v0  ;;  %v684_v32 = vsub.f32 %v3181_v29, %v683_v26  ;;  %v691_v41 = vsub.f32 %v3183_v36, %v690_v37  ;;  %v3768_v49 = vand.u32 4294901760, %v3219_v52  ;;  %v705_v54 = vsub.f32 %v3217_v51, %v3769_v48 }
  0x5d   :  { %v3249_v18 = vpack.c.bf16 %v614_v15, %v611_v14  ;;  %v664_v27 = vand.u32 4294901760, %v663_v23  ;;  %v671_v30 = vand.u32 4294901760, %v670_v24  ;;  %v678_v34 = vand.u32 4294901760, %v677_v31 }
  0x5e   :  { %2151 = vmatmul.mubr.f32.vlgmr.msra.gmra.mrb[0].mxu1 %v153_v11  ;;  %v685_v35 = vand.u32 4294901760, %v684_v32  ;;  %v692_v46 = vand.u32 4294901760, %v691_v41  ;;  %v712_v55 = vsub.f32 %v3219_v52, %v3768_v49  ;;  %v706_v56 = vand.u32 4294901760, %v705_v54 }
  0x5f   :  { %2609 = vmatpush3.bf16.msra.mxu1 %v2608_v42  ;;  %2157 = vmatprep.mubr.msk.f32.mxu1 %vm3076_vm0, %v3077_v1  ;;  %v3271_v33 = vpack.c.bf16 %v671_v30, %v664_v27  ;;  %v698_v42 = vsub.f32 %v3187_v39, %v697_v38  ;;  %v3766_v60 = vand.u32 4294901760, %v3235_v9  ;;  %v3765_v6 = vand.u32 4294901760, %v3237_v10 }
  0x60   :  { %2619 = vmatprep.subr.bf16.mxu1 %v3075_v0  ;;  %v3275_v40 = vpack.c.bf16 %v685_v35, %v678_v34  ;;  %v713_v58 = vand.u32 4294901760, %v712_v55  ;;  %v3763_v30 = vand.u32 4294901760, %v3242_v12  ;;  %v3762_v31 = vand.u32 4294901760, %v3244_v13 }
  0x61   :  { %v699_v47 = vand.u32 4294901760, %v698_v42  ;;  %v726_v2 = vsub.f32 %v3235_v9, %v3766_v60 }
  0x62   :  { %2179 = vmatmul.mubr.f32.vlgmr.msra.gmra.mrb[0].mxu0 %v153_v11  ;;  %v3239_v11 = vsub.f32 %v558_v59, %v602_v61  ;;  %v3767_v59 = vand.u32 4294901760, %v3233_v8  ;;  %v2653_v61 = vpack.c.bf16 %v713_v58, %v706_v56  ;;  %v747_v34 = vsub.f32 %v3242_v12, %v3763_v30 }
  0x63   :  { %2423 = vmatprep.mubr.msk.f32.mxu0 %vm3076_vm0, %v3077_v1  ;;  %v2650_v53 = vpack.c.bf16 %v699_v47, %v692_v46  ;;  %v727_v4 = vand.u32 4294901760, %v726_v2  ;;  %v754_v35 = vsub.f32 %v3244_v13, %v3762_v31  ;;  %v3761_v46 = vand.u32 4294901760, %v3251_v19 }
  0x64   :  { %v719_v63 = vsub.f32 %v3233_v8, %v3767_v59  ;;  %v748_v41 = vand.u32 4294901760, %v747_v34  ;;  %v2686_v34 = vpack.c.bf16 %v3244_v13, %v3242_v12 }
  0x65   :  { %v755_v42 = vand.u32 4294901760, %v754_v35  ;;  %v761_v55 = vsub.f32 %v3251_v19, %v3761_v46 }
  0x66   :  { %2158 = vmatmul.mubr.f32.vlgmr.msra.gmra.mrb[0].mxu1 %v154_v20  ;;  %v3253_v20 = vsub.f32 %v562_v7, %v614_v15  ;;  %v720_v3 = vand.u32 4294901760, %v719_v63  ;;  %v3764_v7 = vand.u32 4294901760, %v3239_v11  ;;  %v733_v15 = vsub.f32 %v3237_v10, %v3765_v6 }
  0x67   :  { %2621 = vmatpush3.bf16.msra.mxu1 %v3199_v43  ;;  %2213 = vmatprep.mubr.msk.f32.mxu1 %vm3076_vm0, %v3077_v1  ;;  %v2662_v54 = vpack.c.bf16 %v755_v42, %v748_v41  ;;  %v762_v58 = vand.u32 4294901760, %v761_v55  ;;  %v1912_v55 = vld [vmem:[%s3758_s4] ss:$0 sm:$0xff] }
  0x68   :  { %2622 = vmatprep.subr.bf16.mxu1 %v3075_v0  ;;  %v2656_v14 = vpack.c.bf16 %v727_v4, %v720_v3  ;;  %v740_v23 = vsub.f32 %v3239_v11, %v3764_v7  ;;  %v734_v24 = vand.u32 4294901760, %v733_v15  ;;  %v3760_v47 = vand.u32 4294901760, %v3253_v20 }
  0x69   :  { %v2668_v3 = vpack.c.bf16 %v3175_v22, %v3173_v21  ;;  %v2671_v4 = vpack.c.bf16 %v3181_v29, %v3179_v28  ;;  %v2674_v15 = vpack.c.bf16 %v3187_v39, %v3183_v36  ;;  %v2689_v35 = vpack.c.bf16 %v3253_v20, %v3251_v19 }
  0x6a   :  { %v741_v27 = vand.u32 4294901760, %v740_v23  ;;  %v768_v56 = vsub.f32 %v3253_v20, %v3760_v47  ;;  %v2677_v23 = vpack.c.bf16 %v3219_v52, %v3217_v51  ;;  %v2722_v21 = vpack.c.bf16 %v697_v38, %v690_v37 }
  0x6b   :  { %2624 = vmatpush3.bf16.msra.mxu1 %v3204_v44  ;;  %v3775_v22 = vand.u32 4294901760, %v3217_v51  ;;  %v3776_v28 = vand.u32 4294901760, %v3219_v52  ;;  %v3779_v36 = vand.u32 4294901760, %v3237_v10  ;;  %v3780_v39 = vand.u32 4294901760, %v3239_v11 }
  0x6c   :  { %2625 = vmatprep.subr.bf16.mxu1 %v3075_v0  ;;  %v2659_v32 = vpack.c.bf16 %v741_v27, %v734_v24  ;;  %v769_v63 = vand.u32 4294901760, %v768_v56  ;;  %v2680_v24 = vpack.c.bf16 %v3235_v9, %v3233_v8  ;;  %v2683_v27 = vpack.c.bf16 %v3239_v11, %v3237_v10  ;;  %v1222_v11 = vld [vmem:[#allocation8 + $0x58] sm:$0xff] }
  0x6d   :  { %v2725_v29 = vpack.c.bf16 %v3776_v28, %v3775_v22  ;;  %v3781_v51 = vand.u32 4294901760, %v3242_v12  ;;  %v3782_v52 = vand.u32 4294901760, %v3244_v13  ;;  %v1266_v12 = vand.u32 4294901760, %v1222_v11  ;;  %v1223_v13 = vld [vmem:[#allocation8 + $0x60] sm:$0xff] }
  0x6e   :  { %v2665_v2 = vpack.c.bf16 %v769_v63, %v762_v58 }
  0x6f   :  { %2627 = vmatpush3.bf16.msra.mxu1 %v3210_v45  ;;  %v2734_v37 = vpack.c.bf16 %v3782_v52, %v3781_v51 }
  0x70   :  { %2628 = vmatprep.subr.bf16.mxu1 %v3075_v0 }
  0x73   :  { %2630 = vmatpush3.bf16.msra.mxu1 %v3215_v50 }
  0x74   :  { %2631 = vmatprep.subr.bf16.mxu1 %v3075_v0 }
  0x77   :  { %2633 = vmatpush3.bf16.msra.mxu1 %v3223_v57 }
  0x78   :  { %2634 = vmatprep.subr.bf16.mxu1 %v3075_v0 }
  0x7b   :  { %2636 = vmatpush3.bf16.msra.mxu1 %v3227_v62 }
  0x7c   :  { %2637 = vmatprep.subr.bf16.mxu1 %v3075_v0 }
  0x7f   :  { %2639 = vmatpush3.bf16.msra.mxu1 %v3231_v5 }
  0x80   :  { %2640 = vmatprep.subr.bf16.mxu1 %v3075_v0 }
  0x83   :  { %2642 = vmatpush3.bf16.msra.mxu1 %v3249_v18 }
  0x84   :  { %2643 = vmatprep.subr.bf16.mxu1 %v3075_v0 }
 0x135   :  { %v541_v41 = vpop.f32.mrb[0].mxu0 }
 0x136   :  { %v2180_v42 = vpop.f32.mrb[1].mxu0 }
 0x139   :  { %v316_v56 = vpop.f32.mrb[0].mxu1 }
 0x13a   :  { %v2907_v58 = vadd.f32 %v1912_v55, %v316_v56  ;;  %v2159_v63 = vpop.f32.mrb[1].mxu1  ;;  %v1218_v55 = vld [vmem:[#allocation8 + $0x38] sm:$0xff] }
 0x13c   :  { %v2908_v47 = vadd.f32 %v2907_v58, %v541_v41  ;;  %v1217_v41 = vld [vmem:[#allocation8 + $0x30] sm:$0xff] }
 0x13e   :  { %v545_v46 = vmul.f32 0.2, %v2908_v47 }
 0x140   :  { %v546_v31 = vmax.f32 %v2908_v47, %v545_v46  ;;  %v1216_v46 = vld [vmem:[#allocation8 + $0x28] sm:$0xff] }
 0x142   :  { %v3342_v30 = vand.u32 4294901760, %v546_v31 }
 0x144   :  { %v3345_v7 = vsub.f32 %v546_v31, %v3342_v30 }
 0x146   :  { %v651_v6 = vand.u32 4294901760, %v3345_v7 }
 0x148   :  { %v652_v42 = vsub.f32 %v3345_v7, %v651_v6 }
 0x14a   :  { %v653_v60 = vand.u32 4294901760, %v652_v42 }
 0x14c   :  { %2214 = vmatmul.mubr.f32.vlgmr.msra.gmra.mrb[2].mxu1 %v653_v60 }
 0x14d   :  { %2645 = vmatpush3.bf16.msra.mxu1 %v3271_v33  ;;  %2248 = vmatprep.mubr.msk.f32.mxu1 %vm3076_vm0, %v3077_v1  ;;  %v1211_v33 = vld [vmem:[#allocation8] sm:$0xff] }
 0x14e   :  { %2646 = vmatprep.subr.bf16.mxu1 %v3075_v0  ;;  %v1233_v60 = vand.u32 4294901760, %v1211_v33 }
 0x150   :  { %v3369_v58 = vsub.f32 %v1211_v33, %v1233_v60  ;;  %v1251_v33 = vand.u32 4294901760, %v1217_v41 }
 0x151   :  { %2648 = vmatpush3.bf16.msra.mxu1 %v3275_v40  ;;  %v1212_v40 = vld [vmem:[#allocation8 + $0x8] sm:$0xff] }
 0x152   :  { %2649 = vmatprep.subr.bf16.mxu1 %v3075_v0 }
 0x155   :  { %2651 = vmatpush3.bf16.msra.mxu1 %v2650_v53  ;;  %v1213_v53 = vld [vmem:[#allocation8 + $0x10] sm:$0xff] }
 0x156   :  { %2652 = vmatprep.subr.bf16.mxu1 %v3075_v0  ;;  %v1239_v31 = vand.u32 4294901760, %v1213_v53 }
 0x158   :  { %v3373_v63 = vsub.f32 %v1213_v53, %v1239_v31 }
 0x159   :  { %2654 = vmatpush3.bf16.msra.mxu1 %v2653_v61  ;;  %v1236_v61 = vand.u32 4294901760, %v1212_v40 }
 0x15a   :  { %2655 = vmatprep.subr.bf16.mxu1 %v3075_v0 }
 0x15b   :  { %v3367_v56 = vpack.c.bf16 %v1236_v61, %v1233_v60  ;;  %v1254_v60 = vand.u32 4294901760, %v1218_v55 }
 0x15d   :  { %2657 = vmatpush3.bf16.msra.mxu1 %v2656_v14  ;;  %v1214_v14 = vld [vmem:[#allocation8 + $0x18] sm:$0xff]  ;;  %2765 = vmatpush3.bf16.msra.mxu0 %v3367_v56  ;;  %v3391_v53 = vsub.f32 %v1218_v55, %v1254_v60 }
 0x15e   :  { %2658 = vmatprep.subr.bf16.mxu1 %v3075_v0  ;;  %v1242_v47 = vand.u32 4294901760, %v1214_v14  ;;  %2766 = vmatprep.subr.bf16.mxu0 %v3075_v0 }
 0x160   :  { %v3375_v42 = vsub.f32 %v1214_v14, %v1242_v47  ;;  %v3383_v49 = vpack.c.bf16 %v1242_v47, %v1239_v31 }
 0x161   :  { %2660 = vmatpush3.bf16.msra.mxu1 %v2659_v32  ;;  %v1215_v32 = vld [vmem:[#allocation8 + $0x20] sm:$0xff] }
 0x162   :  { %2661 = vmatprep.subr.bf16.mxu1 %v3075_v0  ;;  %2768 = vmatpush3.bf16.msra.mxu0 %v3383_v49 }
 0x163   :  { %2769 = vmatprep.subr.bf16.mxu0 %v3075_v0 }
 0x165   :  { %2663 = vmatpush3.bf16.msra.mxu1 %v2662_v54  ;;  %v1245_v54 = vand.u32 4294901760, %v1215_v32 }
 0x166   :  { %2664 = vmatprep.subr.bf16.mxu1 %v3075_v0 }
 0x167   :  { %v3377_v59 = vsub.f32 %v1215_v32, %v1245_v54 }
 0x169   :  { %2666 = vmatpush3.bf16.msra.mxu1 %v2665_v2  ;;  %v1248_v2 = vand.u32 4294901760, %v1216_v46 }
 0x16a   :  { %2667 = vmatprep.subr.bf16.mxu1 %v3075_v0 }
 0x16b   :  { %v3385_v48 = vsub.f32 %v1216_v46, %v1248_v2  ;;  %v3529_v46 = vsub.f32 %v1222_v11, %v1266_v12 }
 0x16c   :  { %2249 = vmatmul.mubr.f32.vlgmr.msra.gmra.mrb[2].mxu1 %v3342_v30 }
 0x16d   :  { %2669 = vmatpush3.bf16.msra.mxu1 %v2668_v3  ;;  %2283 = vmatprep.mubr.msk.f32.mxu1 %vm3076_vm0, %v3077_v1  ;;  %v3371_v3 = vsub.f32 %v1212_v40, %v1236_v61  ;;  %v3389_v40 = vsub.f32 %v1217_v41, %v1251_v33  ;;  %v3405_v61 = vpack.c.bf16 %v1254_v60, %v1251_v33 }
 0x16e   :  { %2670 = vmatprep.subr.bf16.mxu1 %v3075_v0 }
 0x171   :  { %2672 = vmatpush3.bf16.msra.mxu1 %v2671_v4  ;;  %v3397_v4 = vpack.c.bf16 %v1248_v2, %v1245_v54 }
 0x172   :  { %2673 = vmatprep.subr.bf16.mxu1 %v3075_v0 }
 0x173   :  { %2771 = vmatpush3.bf16.msra.mxu0 %v3397_v4 }
 0x174   :  { %2772 = vmatprep.subr.bf16.mxu0 %v3075_v0 }
 0x175   :  { %2675 = vmatpush3.bf16.msra.mxu1 %v2674_v15  ;;  %v2716_v15 = vpack.c.bf16 %v669_v17, %v662_v16  ;;  %v3777_v16 = vand.u32 4294901760, %v3233_v8  ;;  %v3778_v17 = vand.u32 4294901760, %v3235_v9  ;;  %v3783_v8 = vand.u32 4294901760, %v3251_v19 }
 0x176   :  { %2676 = vmatprep.subr.bf16.mxu1 %v3075_v0  ;;  %v3784_v9 = vand.u32 4294901760, %v3253_v20  ;;  %v1269_v19 = vand.u32 4294901760, %v1223_v13 }
 0x177   :  { %2774 = vmatpush3.bf16.msra.mxu0 %v3405_v61 }
 0x178   :  { %2775 = vmatprep.subr.bf16.mxu0 %v3075_v0  ;;  %v2737_v38 = vpack.c.bf16 %v3784_v9, %v3783_v8  ;;  %v3531_v47 = vsub.f32 %v1223_v13, %v1269_v19  ;;  %v1368_v9 = vand.u32 4294901760, %v3389_v40 }
 0x179   :  { %2678 = vmatpush3.bf16.msra.mxu1 %v2677_v23  ;;  %v2719_v23 = vpack.c.bf16 %v683_v26, %v676_v25  ;;  %v2728_v25 = vpack.c.bf16 %v3778_v17, %v3777_v16  ;;  %v2731_v26 = vpack.c.bf16 %v3780_v39, %v3779_v36  ;;  %v1354_v36 = vand.u32 4294901760, %v3377_v59 }
 0x17a   :  { %2679 = vmatprep.subr.bf16.mxu1 %v3075_v0  ;;  %v1361_v39 = vand.u32 4294901760, %v3385_v48 }
 0x17b   :  { %v1355_v51 = vsub.f32 %v3377_v59, %v1354_v36 }
 0x17c   :  { %v1362_v52 = vsub.f32 %v3385_v48, %v1361_v39 }
 0x17d   :  { %2681 = vmatpush3.bf16.msra.mxu1 %v2680_v24 }
 0x17e   :  { %2682 = vmatprep.subr.bf16.mxu1 %v3075_v0  ;;  %v1363_v8 = vand.u32 4294901760, %v1362_v52 }
 0x181   :  { %2684 = vmatpush3.bf16.msra.mxu1 %v2683_v27 }
 0x182   :  { %2685 = vmatprep.subr.bf16.mxu1 %v3075_v0 }
 0x185   :  { %2687 = vmatpush3.bf16.msra.mxu1 %v2686_v34  ;;  %v1326_v34 = vand.u32 4294901760, %v3369_v58 }
 0x186   :  { %2688 = vmatprep.subr.bf16.mxu1 %v3075_v0 }
 0x187   :  { %v1327_v33 = vsub.f32 %v3369_v58, %v1326_v34 }
 0x189   :  { %2690 = vmatpush3.bf16.msra.mxu1 %v2689_v35  ;;  %v1333_v35 = vand.u32 4294901760, %v3371_v3 }
 0x18a   :  { %2691 = vmatprep.subr.bf16.mxu1 %v3075_v0 }
 0x18b   :  { %v1334_v60 = vsub.f32 %v3371_v3, %v1333_v35 }
 0x18c   :  { %2284 = vmatmul.mubr.f32.vlgmr.msra.gmra.mrb[2].mxu1 %v3345_v7  ;;  %v1225_v7 = vld [vmem:[#allocation8 + $0x70] sm:$0xff] }
 0x18d   :  { %2693 = vmatpush3.bf16.msra.mxu1 %v3199_v43  ;;  %2318 = vmatprep.mubr.msk.f32.mxu1 %vm3076_vm0, %v3077_v1  ;;  %v1275_v24 = vand.u32 4294901760, %v1225_v7  ;;  %v1335_v22 = vand.u32 4294901760, %v1334_v60 }
 0x18e   :  { %2694 = vmatprep.subr.bf16.mxu1 %v3075_v0 }
 0x18f   :  { %v3537_v41 = vsub.f32 %v1225_v7, %v1275_v24 }
 0x191   :  { %2696 = vmatpush3.bf16.msra.mxu1 %v3204_v44 }
 0x192   :  { %2697 = vmatprep.subr.bf16.mxu1 %v3075_v0 }
 0x195   :  { %2699 = vmatpush3.bf16.msra.mxu1 %v3210_v45 }
 0x196   :  { %2700 = vmatprep.subr.bf16.mxu1 %v3075_v0 }
 0x199   :  { %2702 = vmatpush3.bf16.msra.mxu1 %v3215_v50 }
 0x19a   :  { %2703 = vmatprep.subr.bf16.mxu1 %v3075_v0 }
 0x19d   :  { %2705 = vmatpush3.bf16.msra.mxu1 %v3223_v57 }
 0x19e   :  { %2706 = vmatprep.subr.bf16.mxu1 %v3075_v0 }
 0x1a1   :  { %2708 = vmatpush3.bf16.msra.mxu1 %v3227_v62 }
 0x1a2   :  { %2709 = vmatprep.subr.bf16.mxu1 %v3075_v0 }
 0x1a5   :  { %2711 = vmatpush3.bf16.msra.mxu1 %v3231_v5 }
 0x1a6   :  { %2712 = vmatprep.subr.bf16.mxu1 %v3075_v0 }
 0x1a9   :  { %2714 = vmatpush3.bf16.msra.mxu1 %v3249_v18 }
 0x1aa   :  { %2715 = vmatprep.subr.bf16.mxu1 %v3075_v0 }
 0x1ac   :  { %2319 = vmatmul.mubr.f32.vlgmr.msra.gmra.mrb[2].mxu1 %v651_v6 }
 0x1ad   :  { %2717 = vmatpush3.bf16.msra.mxu1 %v2716_v15  ;;  %2353 = vmatprep.mubr.msk.f32.mxu1 %vm3076_vm0, %v3077_v1  ;;  %v1340_v15 = vand.u32 4294901760, %v3373_v63 }
 0x1ae   :  { %2718 = vmatprep.subr.bf16.mxu1 %v3075_v0 }
 0x1af   :  { %v1341_v28 = vsub.f32 %v3373_v63, %v1340_v15 }
 0x1b1   :  { %2720 = vmatpush3.bf16.msra.mxu1 %v2719_v23  ;;  %v1347_v23 = vand.u32 4294901760, %v3375_v42  ;;  %v1342_v17 = vand.u32 4294901760, %v1341_v28 }
 0x1b2   :  { %2721 = vmatprep.subr.bf16.mxu1 %v3075_v0 }
 0x1b5   :  { %2723 = vmatpush3.bf16.msra.mxu1 %v2722_v21  ;;  %v1328_v21 = vand.u32 4294901760, %v1327_v33 }
 0x1b6   :  { %2724 = vmatprep.subr.bf16.mxu1 %v3075_v0 }
 0x1b7   :  { %v3557_v16 = vpack.c.bf16 %v1335_v22, %v1328_v21  ;;  %v3773_v22 = vand.u32 4294901760, %v3531_v47 }
 0x1b9   :  { %2726 = vmatpush3.bf16.msra.mxu1 %v2725_v29  ;;  %v1348_v29 = vsub.f32 %v3375_v42, %v1347_v23 }
 0x1ba   :  { %2727 = vmatprep.subr.bf16.mxu1 %v3075_v0 }
 0x1bd   :  { %2729 = vmatpush3.bf16.msra.mxu1 %v2728_v25  ;;  %v1349_v25 = vand.u32 4294901760, %v1348_v29 }
 0x1be   :  { %2730 = vmatprep.subr.bf16.mxu1 %v3075_v0 }
 0x1c1   :  { %2732 = vmatpush3.bf16.msra.mxu1 %v2731_v26  ;;  %v3561_v26 = vpack.c.bf16 %v1349_v25, %v1342_v17  ;;  %v1411_v17 = vsub.f32 %v3531_v47, %v3773_v22 }
 0x1c2   :  { %2733 = vmatprep.subr.bf16.mxu1 %v3075_v0 }
 0x1c5   :  { %2735 = vmatpush3.bf16.msra.mxu1 %v2734_v37  ;;  %v1356_v37 = vand.u32 4294901760, %v1355_v51  ;;  %v1412_v51 = vand.u32 4294901760, %v1411_v17 }
 0x1c6   :  { %2736 = vmatprep.subr.bf16.mxu1 %v3075_v0 }
 0x1c9   :  { %2738 = vmatpush3.bf16.msra.mxu1 %v2737_v38  ;;  %v1375_v38 = vand.u32 4294901760, %v3391_v53 }
 0x1ca   :  { %2739 = vmatprep.subr.bf16.mxu1 %v3075_v0 }
 0x1cc   :  { %2354 = vmatmul.mubr.f32.vlgmr.msra.gmra.mrb[2].mxu1 %v3342_v30 }
 0x1cd   :  { %2741 = vmatpush3.bf16.msra.mxu1 %v3199_v43  ;;  %2388 = vmatprep.mubr.msk.f32.mxu1 %vm3076_vm0, %v3077_v1  ;;  %v1219_v43 = vld [vmem:[#allocation8 + $0x40] sm:$0xff] }
 0x1ce   :  { %2742 = vmatprep.subr.bf16.mxu1 %v3075_v0 }
 0x1d1   :  { %2744 = vmatpush3.bf16.msra.mxu1 %v3204_v44  ;;  %v1220_v44 = vld [vmem:[#allocation8 + $0x48] sm:$0xff] }
 0x1d2   :  { %2745 = vmatprep.subr.bf16.mxu1 %v3075_v0 }
 0x1d5   :  { %2747 = vmatpush3.bf16.msra.mxu1 %v3210_v45  ;;  %v1257_v45 = vand.u32 4294901760, %v1219_v43 }
 0x1d6   :  { %2748 = vmatprep.subr.bf16.mxu1 %v3075_v0 }
 0x1d7   :  { %v3523_v14 = vsub.f32 %v1219_v43, %v1257_v45  ;;  %v2794_v43 = vpack.c.bf16 %v1363_v8, %v1356_v37  ;;  %v3771_v37 = vand.u32 4294901760, %v3537_v41 }
 0x1d9   :  { %2750 = vmatpush3.bf16.msra.mxu1 %v3215_v50  ;;  %v1260_v50 = vand.u32 4294901760, %v1220_v44  ;;  %v1382_v11 = vand.u32 4294901760, %v3523_v14 }
 0x1da   :  { %2751 = vmatprep.subr.bf16.mxu1 %v3075_v0 }
 0x1db   :  { %v3509_v10 = vpack.c.bf16 %v1260_v50, %v1257_v45  ;;  %v3525_v31 = vsub.f32 %v1220_v44, %v1260_v50  ;;  %v1369_v44 = vsub.f32 %v3389_v40, %v1368_v9  ;;  %v1376_v45 = vsub.f32 %v3391_v53, %v1375_v38 }
 0x1dc   :  { %v1383_v13 = vsub.f32 %v3523_v14, %v1382_v11 }
 0x1dd   :  { %2753 = vmatpush3.bf16.msra.mxu1 %v3223_v57  ;;  %v1221_v57 = vld [vmem:[#allocation8 + $0x50] sm:$0xff]  ;;  %2777 = vmatpush3.bf16.msra.mxu0 %v3509_v10  ;;  %v1370_v50 = vand.u32 4294901760, %v1369_v44 }
 0x1de   :  { %2754 = vmatprep.subr.bf16.mxu1 %v3075_v0  ;;  %2778 = vmatprep.subr.bf16.mxu0 %v3075_v0 }
 0x1e1   :  { %2756 = vmatpush3.bf16.msra.mxu1 %v3227_v62  ;;  %v1263_v62 = vand.u32 4294901760, %v1221_v57 }
 0x1e2   :  { %2757 = vmatprep.subr.bf16.mxu1 %v3075_v0 }
 0x1e3   :  { %v3527_v32 = vsub.f32 %v1221_v57, %v1263_v62  ;;  %v1377_v57 = vand.u32 4294901760, %v1376_v45  ;;  %v1425_v45 = vsub.f32 %v3537_v41, %v3771_v37 }
 0x1e5   :  { %2759 = vmatpush3.bf16.msra.mxu1 %v3231_v5  ;;  %v3513_v5 = vpack.c.bf16 %v1266_v12, %v1263_v62  ;;  %v1389_v62 = vand.u32 4294901760, %v3525_v31  ;;  %v2797_v12 = vpack.c.bf16 %v1377_v57, %v1370_v50  ;;  %v1396_v7 = vand.u32 4294901760, %v3527_v32 }
 0x1e6   :  { %2760 = vmatprep.subr.bf16.mxu1 %v3075_v0  ;;  %v1426_v57 = vand.u32 4294901760, %v1425_v45 }
 0x1e7   :  { %2780 = vmatpush3.bf16.msra.mxu0 %v3513_v5 }
 0x1e8   :  { %2781 = vmatprep.subr.bf16.mxu0 %v3075_v0 }
 0x1e9   :  { %2762 = vmatpush3.bf16.msra.mxu1 %v3249_v18  ;;  %v1224_v18 = vld [vmem:[#allocation8 + $0x68] sm:$0xff] }
 0x1ea   :  { %v1272_v20 = vand.u32 4294901760, %v1224_v18 }
 0x1ec   :  { %2389 = vmatmul.mubr.f32.vlgmr.msra.gmra.mrb[2].mxu1 %v3342_v30  ;;  %v3517_v6 = vpack.c.bf16 %v1272_v20, %v1269_v19  ;;  %v1226_v30 = vld [vmem:[#allocation8 + $0x78] sm:$0xff]  ;;  %v3533_v54 = vsub.f32 %v1224_v18, %v1272_v20  ;;  %v1390_v18 = vsub.f32 %v3525_v31, %v1389_v62  ;;  %v1384_v19 = vand.u32 4294901760, %v1383_v13 }
 0x1ed   :  { %v1278_v27 = vand.u32 4294901760, %v1226_v30 }
 0x1ee   :  { %2783 = vmatpush3.bf16.msra.mxu0 %v3517_v6  ;;  %v1391_v20 = vand.u32 4294901760, %v1390_v18  ;;  %v3772_v28 = vand.u32 4294901760, %v3533_v54  ;;  %v2830_v17 = vpack.c.bf16 %v3533_v54, %v3531_v47 }
 0x1ef   :  { %2784 = vmatprep.subr.bf16.mxu0 %v3075_v0  ;;  %v3535_v2 = vpack.c.bf16 %v1278_v27, %v1275_v24  ;;  %v3539_v55 = vsub.f32 %v1226_v30, %v1278_v27  ;;  %v3774_v30 = vand.u32 4294901760, %v3529_v46  ;;  %v1397_v27 = vsub.f32 %v3527_v32, %v1396_v7 }
 0x1f0   :  { %v2800_v24 = vpack.c.bf16 %v1391_v20, %v1384_v19  ;;  %v1418_v25 = vsub.f32 %v3533_v54, %v3772_v28  ;;  %v2812_v19 = vpack.c.bf16 %v3371_v3, %v3369_v58  ;;  %v2815_v20 = vpack.c.bf16 %v3375_v42, %v3373_v63 }
 0x1f1   :  { %v1404_v33 = vsub.f32 %v3529_v46, %v3774_v30  ;;  %v1398_v60 = vand.u32 4294901760, %v1397_v27  ;;  %v3770_v8 = vand.u32 4294901760, %v3539_v55  ;;  %v2818_v27 = vpack.c.bf16 %v3385_v48, %v3377_v59 }
 0x1f2   :  { %2786 = vmatpush3.bf16.msra.mxu0 %v3535_v2  ;;  %v1419_v52 = vand.u32 4294901760, %v1418_v25  ;;  %v2833_v25 = vpack.c.bf16 %v3539_v55, %v3537_v41  ;;  %v2866_v58 = vpack.c.bf16 %v1361_v39, %v1354_v36  ;;  %v2869_v3 = vpack.c.bf16 %v1375_v38, %v1368_v9 }
 0x1f3   :  { %2787 = vmatprep.subr.bf16.mxu0 %v3075_v0  ;;  %v1405_v21 = vand.u32 4294901760, %v1404_v33  ;;  %v1432_v50 = vsub.f32 %v3539_v55, %v3770_v8  ;;  %v2821_v33 = vpack.c.bf16 %v3391_v53, %v3389_v40  ;;  %v2872_v63 = vpack.c.bf16 %v1389_v62, %v1382_v11 }
 0x1f4   :  { %v2806_v44 = vpack.c.bf16 %v1419_v52, %v1412_v51  ;;  %v1913_v51 = vld [vmem:[%s3758_s4 + $0x1] ss:$0 sm:$0xff]  ;;  %v3785_v48 = vand.u32 4294901760, %v3529_v46  ;;  %v3786_v42 = vand.u32 4294901760, %v3531_v47  ;;  %v3787_v40 = vand.u32 4294901760, %v3533_v54 }
 0x1f5   :  { %v2803_v29 = vpack.c.bf16 %v1405_v21, %v1398_v60  ;;  %v1433_v13 = vand.u32 4294901760, %v1432_v50  ;;  %v2824_v60 = vpack.c.bf16 %v3525_v31, %v3523_v14  ;;  %v2827_v21 = vpack.c.bf16 %v3529_v46, %v3527_v32  ;;  %v1916_v31 = vld [vmem:[%s3758_s4 + $0x4] ss:$0 sm:$0xff] }
 0x1f6   :  { %v2875_v59 = vpack.c.bf16 %v3785_v48, %v1396_v7  ;;  %v2878_v53 = vpack.c.bf16 %v3787_v40, %v3786_v42 }
 0x1f7   :  { %v2809_v18 = vpack.c.bf16 %v1433_v13, %v1426_v57 }
 0x2bf   :  { %v1205_v52 = vpop.f32.mrb[2].mxu1 }
 0x2c0   :  { %v2909_v45 = vadd.f32 %v1913_v51, %v1205_v52  ;;  %v2390_v50 = vpop.f32.mrb[3].mxu1 }
 0x2c2   :  { %v1209_v57 = vmul.f32 0.2, %v2909_v45 }
 0x2c4   :  { %v1210_v13 = vmax.f32 %v2909_v45, %v1209_v57 }
 0x2c6   :  { %v3628_v8 = vand.u32 4294901760, %v1210_v13 }
 0x2c8   :  { %v1314_v37 = vsub.f32 %v1210_v13, %v3628_v8 }
 0x2ca   :  { %v1315_v28 = vand.u32 4294901760, %v1314_v37 }
 0x2cc   :  { %v1316_v22 = vsub.f32 %v1314_v37, %v1315_v28 }
 0x2ce   :  { %v1317_v30 = vand.u32 4294901760, %v1316_v22 }
 0x2d0   :  { %2424 = vmatmul.mubr.f32.vlgmr.msra.gmra.mrb[2].mxu0 %v1317_v30 }
 0x2d1   :  { %2789 = vmatpush3.bf16.msra.mxu0 %v3557_v16  ;;  %2458 = vmatprep.mubr.msk.f32.mxu0 %vm3076_vm0, %v3077_v1  ;;  %v2860_v16 = vpack.c.bf16 %v1333_v35, %v1326_v34  ;;  %v3788_v34 = vand.u32 4294901760, %v3537_v41  ;;  %v3789_v35 = vand.u32 4294901760, %v3539_v55 }
 0x2d2   :  { %2790 = vmatprep.subr.bf16.mxu0 %v3075_v0 }
 0x2d3   :  { %v2881_v14 = vpack.c.bf16 %v3789_v35, %v3788_v34 }
 0x2d5   :  { %2792 = vmatpush3.bf16.msra.mxu0 %v3561_v26  ;;  %v2863_v26 = vpack.c.bf16 %v1347_v23, %v1340_v15 }
 0x2d6   :  { %2793 = vmatprep.subr.bf16.mxu0 %v3075_v0 }
 0x2d9   :  { %2795 = vmatpush3.bf16.msra.mxu0 %v2794_v43 }
 0x2da   :  { %2796 = vmatprep.subr.bf16.mxu0 %v3075_v0 }
 0x2dd   :  { %2798 = vmatpush3.bf16.msra.mxu0 %v2797_v12 }
 0x2de   :  { %2799 = vmatprep.subr.bf16.mxu0 %v3075_v0 }
 0x2e1   :  { %2801 = vmatpush3.bf16.msra.mxu0 %v2800_v24 }
 0x2e2   :  { %2802 = vmatprep.subr.bf16.mxu0 %v3075_v0 }
 0x2e5   :  { %2804 = vmatpush3.bf16.msra.mxu0 %v2803_v29 }
 0x2e6   :  { %2805 = vmatprep.subr.bf16.mxu0 %v3075_v0 }
 0x2e9   :  { %2807 = vmatpush3.bf16.msra.mxu0 %v2806_v44 }
 0x2ea   :  { %2808 = vmatprep.subr.bf16.mxu0 %v3075_v0 }
 0x2ed   :  { %2810 = vmatpush3.bf16.msra.mxu0 %v2809_v18 }
 0x2ee   :  { %2811 = vmatprep.subr.bf16.mxu0 %v3075_v0 }
 0x2f0   :  { %2459 = vmatmul.mubr.f32.vlgmr.msra.gmra.mrb[2].mxu0 %v3628_v8 }
 0x2f1   :  { %2813 = vmatpush3.bf16.msra.mxu0 %v2812_v19  ;;  %2493 = vmatprep.mubr.msk.f32.mxu0 %vm3076_vm0, %v3077_v1 }
 0x2f2   :  { %2814 = vmatprep.subr.bf16.mxu0 %v3075_v0 }
 0x2f5   :  { %2816 = vmatpush3.bf16.msra.mxu0 %v2815_v20 }
 0x2f6   :  { %2817 = vmatprep.subr.bf16.mxu0 %v3075_v0 }
 0x2f9   :  { %2819 = vmatpush3.bf16.msra.mxu0 %v2818_v27 }
 0x2fa   :  { %2820 = vmatprep.subr.bf16.mxu0 %v3075_v0 }
 0x2fd   :  { %2822 = vmatpush3.bf16.msra.mxu0 %v2821_v33 }
 0x2fe   :  { %2823 = vmatprep.subr.bf16.mxu0 %v3075_v0 }
 0x301   :  { %2825 = vmatpush3.bf16.msra.mxu0 %v2824_v60 }
 0x302   :  { %2826 = vmatprep.subr.bf16.mxu0 %v3075_v0 }
 0x305   :  { %2828 = vmatpush3.bf16.msra.mxu0 %v2827_v21 }
 0x306   :  { %2829 = vmatprep.subr.bf16.mxu0 %v3075_v0 }
 0x309   :  { %2831 = vmatpush3.bf16.msra.mxu0 %v2830_v17 }
 0x30a   :  { %2832 = vmatprep.subr.bf16.mxu0 %v3075_v0 }
 0x30d   :  { %2834 = vmatpush3.bf16.msra.mxu0 %v2833_v25 }
 0x30e   :  { %2835 = vmatprep.subr.bf16.mxu0 %v3075_v0 }
 0x310   :  { %2494 = vmatmul.mubr.f32.vlgmr.msra.gmra.mrb[2].mxu0 %v1314_v37 }
 0x311   :  { %2837 = vmatpush3.bf16.msra.mxu0 %v3367_v56  ;;  %2528 = vmatprep.mubr.msk.f32.mxu0 %vm3076_vm0, %v3077_v1 }
 0x312   :  { %2838 = vmatprep.subr.bf16.mxu0 %v3075_v0 }
 0x315   :  { %2840 = vmatpush3.bf16.msra.mxu0 %v3383_v49 }
 0x316   :  { %2841 = vmatprep.subr.bf16.mxu0 %v3075_v0 }
 0x319   :  { %2843 = vmatpush3.bf16.msra.mxu0 %v3397_v4 }
 0x31a   :  { %2844 = vmatprep.subr.bf16.mxu0 %v3075_v0 }
 0x31d   :  { %2846 = vmatpush3.bf16.msra.mxu0 %v3405_v61 }
 0x31e   :  { %2847 = vmatprep.subr.bf16.mxu0 %v3075_v0 }
 0x321   :  { %2849 = vmatpush3.bf16.msra.mxu0 %v3509_v10 }
 0x322   :  { %2850 = vmatprep.subr.bf16.mxu0 %v3075_v0 }
 0x325   :  { %2852 = vmatpush3.bf16.msra.mxu0 %v3513_v5 }
 0x326   :  { %2853 = vmatprep.subr.bf16.mxu0 %v3075_v0 }
 0x329   :  { %2855 = vmatpush3.bf16.msra.mxu0 %v3517_v6 }
 0x32a   :  { %2856 = vmatprep.subr.bf16.mxu0 %v3075_v0 }
 0x32d   :  { %2858 = vmatpush3.bf16.msra.mxu0 %v3535_v2 }
 0x32e   :  { %2859 = vmatprep.subr.bf16.mxu0 %v3075_v0 }
 0x330   :  { %2529 = vmatmul.mubr.f32.vlgmr.msra.gmra.mrb[2].mxu0 %v1315_v28 }
 0x331   :  { %2861 = vmatpush3.bf16.msra.mxu0 %v2860_v16  ;;  %2563 = vmatprep.mubr.msk.f32.mxu0 %vm3076_vm0, %v3077_v1 }
 0x332   :  { %2862 = vmatprep.subr.bf16.mxu0 %v3075_v0 }
 0x335   :  { %2864 = vmatpush3.bf16.msra.mxu0 %v2863_v26 }
 0x336   :  { %2865 = vmatprep.subr.bf16.mxu0 %v3075_v0 }
 0x339   :  { %2867 = vmatpush3.bf16.msra.mxu0 %v2866_v58 }
 0x33a   :  { %2868 = vmatprep.subr.bf16.mxu0 %v3075_v0 }
 0x33d   :  { %2870 = vmatpush3.bf16.msra.mxu0 %v2869_v3 }
 0x33e   :  { %2871 = vmatprep.subr.bf16.mxu0 %v3075_v0 }
 0x341   :  { %2873 = vmatpush3.bf16.msra.mxu0 %v2872_v63 }
 0x342   :  { %2874 = vmatprep.subr.bf16.mxu0 %v3075_v0 }
 0x345   :  { %2876 = vmatpush3.bf16.msra.mxu0 %v2875_v59 }
 0x346   :  { %2877 = vmatprep.subr.bf16.mxu0 %v3075_v0 }
 0x349   :  { %2879 = vmatpush3.bf16.msra.mxu0 %v2878_v53 }
 0x34a   :  { %2880 = vmatprep.subr.bf16.mxu0 %v3075_v0 }
 0x34d   :  { %2882 = vmatpush3.bf16.msra.mxu0 %v2881_v14 }
 0x34e   :  { %2883 = vmatprep.subr.bf16.mxu0 %v3075_v0 }
 0x350   :  { %2564 = vmatmul.mubr.f32.vlgmr.msra.gmra.mrb[2].mxu0 %v3628_v8 }
 0x351   :  { %2885 = vmatpush3.bf16.msra.mxu0 %v3367_v56  ;;  %2598 = vmatprep.mubr.msk.f32.mxu0 %vm3076_vm0, %v3077_v1  ;;  %v1914_v1 = vld [vmem:[%s3758_s4 + $0x2] ss:$0 sm:$0xff] }
 0x352   :  { %2886 = vmatprep.subr.bf16.mxu0 %v3075_v0 }
 0x355   :  { %2888 = vmatpush3.bf16.msra.mxu0 %v3383_v49 }
 0x356   :  { %2889 = vmatprep.subr.bf16.mxu0 %v3075_v0 }
 0x359   :  { %2891 = vmatpush3.bf16.msra.mxu0 %v3397_v4 }
 0x35a   :  { %2892 = vmatprep.subr.bf16.mxu0 %v3075_v0 }
 0x35d   :  { %2894 = vmatpush3.bf16.msra.mxu0 %v3405_v61 }
 0x35e   :  { %2895 = vmatprep.subr.bf16.mxu0 %v3075_v0 }
 0x361   :  { %2897 = vmatpush3.bf16.msra.mxu0 %v3509_v10  ;;  %v1915_v10 = vld [vmem:[%s3758_s4 + $0x3] ss:$0 sm:$0xff] }
 0x362   :  { %2898 = vmatprep.subr.bf16.mxu0 %v3075_v0 }
 0x365   :  { %2900 = vmatpush3.bf16.msra.mxu0 %v3513_v5 }
 0x366   :  { %2901 = vmatprep.subr.bf16.mxu0 %v3075_v0 }
 0x369   :  { %2903 = vmatpush3.bf16.msra.mxu0 %v3517_v6 }
 0x36a   :  { %2904 = vmatprep.subr.bf16.mxu0 %v3075_v0  ;;  %v3078_v0 = vmov 0  }
 0x36b   :  { %2950 = vset.pattern.permute.xlu0 %v3078_v0 }
 0x36d   :  { %2906 = vmatpush3.bf16.msra.mxu0 %v3535_v2 }
 0x370   :  { %2599 = vmatmul.mubr.f32.vlgmr.msra.gmra.mrb[2].mxu0 %v3628_v8 }
 0x443   :  { %v1869_v49 = vpop.f32.mrb[2].mxu0 }
 0x444   :  { %v2910_v56 = vadd.f32 %v1914_v1, %v1869_v49  ;;  %v2600_v4 = vpop.f32.mrb[3].mxu0 }
 0x446   :  { %v1873_v61 = vmul.f32 0.2, %v2910_v56 }
 0x448   :  { %v1874_v5 = vmax.f32 %v2910_v56, %v1873_v61 }
 0x44a   :  { %v1880_v6 = vmul.f32 %v1915_v10, %v1874_v5 }
 0x44c   :  { %1881 = vadd.xlane.f32.xlu0 %v1880_v6 }
 0x4d9   :  { %v1882_v32 = vpop.xlane.xlu0 %1881 }
 0x4da   :  { %v1888_v46 = vadd.f32 %v1916_v31, %v1882_v32 }
 0x4dc   :  { %1891 = vperm.xlu0 %2950, %v1888_v46  }
 0x55b   :  { %v1892_v47 = vpop.permute.xlu0 %1891 }
 0x55c   :  { %1894 = vst [vmem:[#allocation10] sm:$0xff] %v1892_v47 }
 0x55d   :  { %3050 = shalt.err (!%p3047_p8)
}
 0x55e   :  { %s3051_s0 = scalar_lea.hbm %s3759_s5, 128 }
 0x55f   :  { %p3052_p9 = scmp.ne.s32.totalorder %s3759_s5, %s3051_s0  ;;  %p3055_p10 = scmp.lt.u32.totalorder %s3051_s0, %s3759_s5 }
 0x561   :  { %p3057_p11 = pnand %p3055_p10, %p3052_p9 }
 0x563   :  { %3060 = shalt.err (!%p3057_p11)
}
 0x564   :  { %1904 = dma.vmem_to_hbm [thread:$0]  %s1902_s24, 128, %s3759_s5, [#allocation4]  }
 0x565   :  { %3067 = dma.done.wait [#allocation4], 128  }
 0x566   :  { %3068 = vsyncadd [#allocation4], 4294967168 }
 0x567   :  { %1908 = vsyncpa [#allocation3], 1 }
 0x568   :  { %1909 = vsyncpa [#allocation6], 1 }
 0x569   :  { %1910 = vsyncpa [#allocation9], 1 }
 0x56a   :  { %1911 = vsyncpa [#allocation4], 1 }

</bundles_post_ra>
